<compile_context>
chip_gen: v7x
topology: tpu7x:2x2x1
jax: 0.10.0
libtpu: 0.0.40
codegen_flags: <defaults>
</compile_context>

<pallas_src>
import functools

import jax
import jax.numpy as jnp
from jax import lax
from jax.experimental import pallas as pl
from jax.experimental.pallas import tpu as pltpu


def _round_up(v, m):
    return ((v + m - 1) // m) * m


def _focal_loss_kernel(*refs, gamma, gamma_is_int, n_total, tile_n,
                       mask_rows, has_alpha):
    if has_alpha:
        logits_ref, targets_ref, alpha_ref, out_ref = refs
    else:
        logits_ref, targets_ref, out_ref = refs
        alpha_ref = None

    x = logits_ref[...].astype(jnp.float32)        # (tile, C) logits
    t = targets_ref[...]                           # (tile, 1) int32 class ids
    tn, c = x.shape

    row_valid = None
    if mask_rows:
        row = lax.broadcasted_iota(jnp.int32, (tn, 1), 0)
        row_valid = (pl.program_id(0) * tile_n + row) < n_total   # (tile, 1)
        # Zero logits of batch-overhang rows so max/exp/log stay finite.
        x = jnp.where(row_valid, x, 0.0)

    # One-hot class mask (the module's scatter_) via lane-iota compare.
    col = lax.broadcasted_iota(jnp.int32, (tn, c), 1)
    onehot = (col == t).astype(jnp.float32)        # (tile, C)

    # Log-softmax gather: log p_t = x_t - max(x) - log(sum exp(x - max)).
    m = jnp.max(x, axis=1, keepdims=True)                    # (tile, 1)
    s = jnp.sum(jnp.exp(x - m), axis=1, keepdims=True)       # (tile, 1)
    x_t = jnp.sum(x * onehot, axis=1, keepdims=True)         # (tile, 1)
    log_p = x_t - m - jnp.log(s)                             # log p_t
    p = jnp.exp(log_p)                                       # p_t

    one_minus_p = 1.0 - p
    if gamma_is_int:
        focal = lax.integer_pow(one_minus_p, gamma)          # VPU multiplies
    else:
        focal = jnp.power(one_minus_p, gamma)
    row_loss = focal * (-log_p)                              # (tile, 1)

    if has_alpha:
        a_t = alpha_ref[...].astype(jnp.float32)             # pre-gathered alpha[t]
        if mask_rows:
            a_t = jnp.where(row_valid, a_t, 0.0)
        row_loss = a_t * row_loss

    if mask_rows:
        row_loss = jnp.where(row_valid, row_loss, 0.0)

    # Lane-dense per-tile partial sum; final mean/sum done in the wrapper.
    out_ref[...] = jnp.broadcast_to(jnp.sum(row_loss), out_ref.shape)


def focal_loss(logits, targets, alpha=None, *, gamma=2.0, size_average=True,
               tile_n=None, vmem_budget_bytes=12 * 1024 * 1024):
    """Pallas FocalLoss forward.

    logits:  (N, C) float (f32 or bf16; kept in input dtype in HBM)
    targets: (N,)   int class indices in [0, C)
    alpha:   (C, 1) per-class weights, or None for the module default (ones),
             which statically skips the alpha path entirely.
    """
    n, c = logits.shape
    has_alpha = alpha is not None

    # --- Tile sizing: fill a VMEM budget with double-buffered input blocks.
    # (tile, 1) int32/f32 blocks are lane-padded to 128 lanes in VMEM.
    c_lanes = _round_up(c, 128)
    itemsize = jnp.dtype(logits.dtype).itemsize
    per_row = 2 * (c_lanes * itemsize + 128 * 4
                   + (128 * 4 if has_alpha else 0))
    tile = max(8, vmem_budget_bytes // per_row)
    if tile_n is not None:
        tile = min(tile, int(tile_n))
    # Keep >= 2 grid steps so the "parallel" axis can shard across 2 TCs (v7x).
    tile = min(tile, _round_up(pl.cdiv(n, 2), 8))
    tile = max(8, (tile // 8) * 8)

    num_tiles = pl.cdiv(n, tile)
    mask_rows = num_tiles * tile != n

    targets_col = targets.astype(jnp.int32).reshape(n, 1)

    gamma_f = float(gamma)
    gamma_is_int = gamma_f.is_integer()
    kernel = functools.partial(
        _focal_loss_kernel,
        gamma=int(gamma_f) if gamma_is_int else gamma_f,
        gamma_is_int=gamma_is_int,
        n_total=n, tile_n=tile, mask_rows=mask_rows, has_alpha=has_alpha)

    in_specs = [
        pl.BlockSpec((tile, c), lambda i: (i, 0)),   # logits (no wrapper pad)
        pl.BlockSpec((tile, 1), lambda i: (i, 0)),   # targets column
    ]
    inputs = [logits, targets_col]
    if has_alpha:
        alpha_t = alpha.reshape(-1).astype(jnp.float32)[targets].reshape(n, 1)
        in_specs.append(pl.BlockSpec((tile, 1), lambda i: (i, 0)))
        inputs.append(alpha_t)

    partials = pl.pallas_call(
        kernel,
        out_shape=jax.ShapeDtypeStruct((num_tiles, 8, 128), jnp.float32),
        grid=(num_tiles,),
        in_specs=in_specs,
        out_specs=pl.BlockSpec((1, 8, 128), lambda i: (i, 0, 0)),
        compiler_params=pltpu.CompilerParams(
            dimension_semantics=("parallel",),
            vmem_limit_bytes=32 * 1024 * 1024),
    )(*inputs)

    total = jnp.sum(partials[:, 0, 0])
    return total / n if size_average else total


def focal_loss_ref(logits, targets, alpha=None, *, gamma=2.0,
                   size_average=True):
    """Pure-JAX reference mirroring the PyTorch module exactly."""
    n, c = logits.shape
    p = jax.nn.softmax(logits.astype(jnp.float32), axis=1)
    mask = jax.nn.one_hot(targets, c, dtype=jnp.float32)
    probs = jnp.sum(p * mask, axis=1, keepdims=True)
    if alpha is None:
        alpha = jnp.ones((c, 1), jnp.float32)
    alpha_t = alpha.reshape(-1)[targets].reshape(n, 1).astype(jnp.float32)
    batch_loss = -alpha_t * jnp.power(1.0 - probs, gamma) * jnp.log(probs)
    return jnp.mean(batch_loss) if size_average else jnp.sum(batch_loss)


if __name__ == "__main__":
    # Module defaults: class_num=92, alpha=ones(92,1), gamma=2, size_average.
    CLASS_NUM = 92
    N = 8

    key = jax.random.PRNGKey(0)
    k1, k2, k3, k4, k5 = jax.random.split(key, 5)
    logits = jax.random.normal(k1, (N, CLASS_NUM), dtype=jnp.float32)
    targets = jax.random.randint(k2, (N,), 0, CLASS_NUM, dtype=jnp.int32)

    # Default-alpha path (ones -> alpha statically skipped in-kernel).
    loss = focal_loss(logits, targets, alpha=None, gamma=2.0,
                      size_average=True)
    loss = jax.block_until_ready(loss)
    ref = focal_loss_ref(logits, targets, None, gamma=2.0, size_average=True)
    assert jnp.allclose(loss, ref, rtol=1e-5, atol=1e-5), (loss, ref)

    # Multi-tile / ragged-last-tile path with an explicit non-uniform alpha.
    N2 = 200
    logits2 = jax.random.normal(k3, (N2, CLASS_NUM), dtype=jnp.float32)
    targets2 = jax.random.randint(k4, (N2,), 0, CLASS_NUM, dtype=jnp.int32)
    alpha2 = jax.random.uniform(k5, (CLASS_NUM, 1), dtype=jnp.float32,
                                minval=0.25, maxval=1.0)
    loss2 = focal_loss(logits2, targets2, alpha2, gamma=2.0,
                       size_average=False, tile_n=64)
    loss2 = jax.block_until_ready(loss2)
    ref2 = focal_loss_ref(logits2, targets2, alpha2, gamma=2.0,
                          size_average=False)
    assert jnp.allclose(loss2, ref2, rtol=1e-5, atol=1e-4), (loss2, ref2)

    print("KERNEL_OK")
</pallas_src>

<mosaic_0001>
module attributes {stable_mosaic.version = 11 : i64} {
  func.func @_focal_loss_kernel(%arg0: i32, %arg1: memref<8x92xf32, #tpu.memory_space<vmem>>, %arg2: memref<8x1xi32, #tpu.memory_space<vmem>>, %arg3: memref<1x8x128xf32, #tpu.memory_space<vmem>>) attributes {dimension_semantics = [#tpu.dimension_semantics<parallel>], iteration_bounds = array<i64: 1>, scalar_prefetch = 0 : i64, scratch_operands = 0 : i64, tpu.core_type = #tpu.core_type<tc>, window_params = [{transform_indices = @transform_0, window_bounds = array<i64: 8, 92>}, {transform_indices = @transform_1, window_bounds = array<i64: 8, 1>}, {transform_indices = @transform_2, window_bounds = array<i64: 1, 8, 128>}]} {
    %c0 = arith.constant 0 : index
    %c0_0 = arith.constant 0 : index
    %0 = vector.load %arg1[%c0, %c0_0] : memref<8x92xf32, #tpu.memory_space<vmem>>, vector<8x92xf32>
    %c0_1 = arith.constant 0 : index
    %c0_2 = arith.constant 0 : index
    %1 = vector.load %arg2[%c0_1, %c0_2] : memref<8x1xi32, #tpu.memory_space<vmem>>, vector<8x1xi32>
    %2 = tpu.iota {dimensions = array<i32: 1>} : vector<8x92xi32>
    %3 = vector.broadcast %1 : vector<8x1xi32> to vector<8x92xi32>
    %4 = arith.cmpi eq, %2, %3 : vector<8x92xi32>
    %5 = arith.extui %4 : vector<8x92xi1> to vector<8x92xi32>
    %6 = arith.sitofp %5 : vector<8x92xi32> to vector<8x92xf32>
    %cst = arith.constant dense<0xFF800000> : vector<8xf32>
    %7 = vector.multi_reduction <maximumf>, %0, %cst [1] : vector<8x92xf32> to vector<8xf32>
    %8 = vector.shape_cast %7 : vector<8xf32> to vector<8x1xf32>
    %9 = vector.broadcast %8 : vector<8x1xf32> to vector<8x92xf32>
    %10 = arith.subf %0, %9 : vector<8x92xf32>
    %11 = math.exp %10 : vector<8x92xf32>
    %cst_3 = arith.constant dense<0.000000e+00> : vector<8xf32>
    %12 = vector.multi_reduction <add>, %11, %cst_3 [1] : vector<8x92xf32> to vector<8xf32>
    %13 = vector.shape_cast %12 : vector<8xf32> to vector<8x1xf32>
    %14 = arith.mulf %0, %6 : vector<8x92xf32>
    %cst_4 = arith.constant dense<0.000000e+00> : vector<8xf32>
    %15 = vector.multi_reduction <add>, %14, %cst_4 [1] : vector<8x92xf32> to vector<8xf32>
    %16 = vector.shape_cast %15 : vector<8xf32> to vector<8x1xf32>
    %17 = arith.subf %16, %8 : vector<8x1xf32>
    %18 = math.log %13 : vector<8x1xf32>
    %19 = arith.subf %17, %18 : vector<8x1xf32>
    %20 = math.exp %19 : vector<8x1xf32>
    %cst_5 = arith.constant 1.000000e+00 : f32
    %21 = vector.broadcast %cst_5 : f32 to vector<8x1xf32>
    %22 = arith.subf %21, %20 : vector<8x1xf32>
    %23 = arith.mulf %22, %22 : vector<8x1xf32>
    %cst_6 = arith.constant 0.000000e+00 : f32
    %24 = vector.broadcast %cst_6 : f32 to vector<8x1xf32>
    %25 = arith.subf %24, %19 : vector<8x1xf32>
    %26 = arith.mulf %23, %25 : vector<8x1xf32>
    %27 = vector.shape_cast %26 : vector<8x1xf32> to vector<1x8x1xf32>
    %cst_7 = arith.constant dense<0.000000e+00> : vector<1xf32>
    %28 = vector.multi_reduction <add>, %27, %cst_7 [1, 2] : vector<1x8x1xf32> to vector<1xf32>
    %29 = vector.shape_cast %28 : vector<1xf32> to vector<1x1x1xf32>
    %30 = vector.extract %29[0, 0, 0] : f32 from vector<1x1x1xf32>
    %31 = vector.broadcast %30 : f32 to vector<1x8x128xf32>
    %c0_8 = arith.constant 0 : index
    %c0_9 = arith.constant 0 : index
    %c0_10 = arith.constant 0 : index
    %32 = vector.load %arg3[%c0_8, %c0_9, %c0_10] : memref<1x8x128xf32, #tpu.memory_space<vmem>>, vector<1x8x128xf32>
    tpu.vector_store %arg3[%c0_8, %c0_9, %c0_10], %31 {strides = array<i32>} : memref<1x8x128xf32, #tpu.memory_space<vmem>>, vector<1x8x128xf32>,
    return
  }
  func.func @transform_0(%arg0: i32) -> (i32, i32) {
    %c0_i32 = arith.constant 0 : i32
    %c0_i32_0 = arith.constant 0 : i32
    return %arg0, %c0_i32 : i32, i32
  }
  func.func @transform_1(%arg0: i32) -> (i32, i32) {
    %c0_i32 = arith.constant 0 : i32
    %c0_i32_0 = arith.constant 0 : i32
    return %arg0, %c0_i32 : i32, i32
  }
  func.func @transform_2(%arg0: i32) -> (i32, i32, i32) {
    %c0_i32 = arith.constant 0 : i32
    %c0_i32_0 = arith.constant 0 : i32
    %c0_i32_1 = arith.constant 0 : i32
    return %arg0, %c0_i32, %c0_i32_0 : i32, i32, i32
  }
}

</mosaic_0001>

<bundles_post_ra>
// kernel: tpu_custom_call.1
= control target key start
LH: loop header
LB: loop body
LE: loop exit
PB: predicated region body
PF: predicated region fallthrough
CT: control target
= control target key end

     0   :  { %vm22_vm0 = vcmask 752640   ;;  %s149_s0 = inlined_call_operand.vmem [shape: f32[8,92], index: 0, kind: input, shape index: {}]   ;;  %s150_s1 = inlined_call_operand.vmem [shape: s32[8,1], index: 1, kind: input, shape index: {}]   ;;  %s151_s2 = inlined_call_operand.hbm [shape: f32[1,8,128], index: 2, kind: output, shape index: {}]  }
   0x1   :  { %v12_v0 = vld [vmem:[%s149_s0] sm:$0xff] }
   0x2   :  { %7 = vsyncpa [#allocation3], 0  ;;  %v23_v1 = vsel %vm22_vm0, %v12_v0, -inf  ;;  %v110_v2 = vmov 0   ;;  %v13_v3 = vld [vmem:[%s150_s1] sm:$0xff]  ;;  %v14_v6 = vlaneseq  ;;  %v111_v10 = vmov 0.0  }
   0x3   :  { %79 = vset.pattern.permute.xlu0 %v110_v2  ;;  %vm46_vm2 = vcmask 7168   ;;  %s112_s0 = smov [#allocation2]  }
   0x4   :  { %24 = vmax.xlane.f32.xlu0 %v23_v1  ;;  %v15_v8 = vand.u32 127, %v14_v6  ;;  %s65_s1 = sshll.u32 %s112_s0, 4  ;;  %s66_s1 = int_to_ptr.vmem [resolvable:$true] %s65_s1 }
   0x5   :  { %s86_s14 = scalar_lea.vmem %s66_s1, 128  ;;  %p91_p1 = scmp.lt.s32.totalorder %s66_s1, %s66_s1 }
   0x6   :  { %p87_p0 = scmp.ne.s32.totalorder %s66_s1, %s86_s14  ;;  %p92_p2 = scmp.lt.s32.totalorder %s86_s14, %s86_s14 }
   0x8   :  { %p93_p3 = por %p92_p2, %p91_p1 }
   0xa   :  { %p94_p4 = pnand %p93_p3, %p87_p0 }
  0x1a   :  { %17 = vperm.xlu0 %79, %v13_v3  }
  0x91   :  { %v25_v4 = vpop.xlane.xlu0 %24 }
  0x92   :  { %v26_v5 = vsub.f32 %v12_v0, %v25_v4 }
  0x94   :  { %v27_v7 = vmul.f32 1.442695, %v26_v5 }
  0x96   :  { %80 = vpow2.f32 %v27_v7 }
  0x99   :  { %v18_v9 = vpop.permute.xlu0 %17 }
  0x9a   :  { %vm19_vm1 = vcmp.eq.s32.totalorder %v15_v8, %v18_v9 }
  0x9b   :  { %v73_v11 = vsel %vm19_vm1, 1.0, %v111_v10 }
  0x9c   :  { %v32_v12 = vmul.f32 %v73_v11, %v12_v0 }
  0x9e   :  { %v33_v15 = vsel %vm22_vm0, %v32_v12, 0.0 }
  0xa0   :  { %v81_v13 = vpop.eup %80 }
  0xa1   :  { %v29_v14 = vsel %vm22_vm0, %v81_v13, 0.0 }
  0xa2   :  { %30 = vadd.xlane.f32.xlu1 %v29_v14 }
  0xa6   :  { %34 = vadd.xlane.f32.xlu1 %v33_v15 }
 0x12f   :  { %v31_v16 = vpop.xlane.xlu1 %30 }
 0x130   :  { %82 = vlog2.f32 %v31_v16 }
 0x133   :  { %v35_v17 = vpop.xlane.xlu1 %34 }
 0x134   :  { %v36_v20 = vsub.f32 %v35_v17, %v25_v4 }
 0x13a   :  { %v83_v18 = vpop.eup %82 }
 0x13b   :  { %v38_v19 = vmul.f32 0.6931472, %v83_v18 }
 0x13d   :  { %v39_v21 = vsub.f32 %v36_v20, %v38_v19 }
 0x13f   :  { %v40_v22 = vmul.f32 1.442695, %v39_v21  ;;  %v44_v26 = vsub.f32 0.0, %v39_v21 }
 0x141   :  { %84 = vpow2.f32 %v40_v22 }
 0x14b   :  { %v85_v23 = vpop.eup %84 }
 0x14c   :  { %v42_v24 = vsub.f32 1.0, %v85_v23 }
 0x14e   :  { %v43_v25 = vmul.f32 %v42_v24, %v42_v24 }
 0x150   :  { %v45_v27 = vmul.f32 %v44_v26, %v43_v25 }
 0x152   :  { %v47_v28 = vsel %vm46_vm2, %v45_v27, 0.0 }
 0x153   :  { %48 = vadd.xlane.f32.xlu1 %v47_v28 }
 0x1e0   :  { %v49_v29 = vpop.xlane.xlu1 %48 }
 0x1e1   :  { %v50_v30 = vrot.slane %v49_v29, 4 }
 0x1e3   :  { %v51_v31 = vadd.f32 %v50_v30, %v49_v29 }
 0x1e5   :  { %v52_v32 = vrot.slane %v51_v31, 2 }
 0x1e7   :  { %v53_v33 = vadd.f32 %v52_v32, %v51_v31 }
 0x1e9   :  { %v54_v34 = vrot.slane %v53_v33, 1 }
 0x1eb   :  { %v55_v35 = vadd.f32 %v54_v34, %v53_v33 }
 0x1ed   :  { %74 = vpush %v55_v35 }
 0x21e   :  { %s75_s13 = spop %74 }
 0x21f   :  { %v57_v36 = vstv %s75_s13 }
 0x220   :  { %58 = vst [vmem:[#allocation2] sm:$0xff] %v57_v36 }
 0x221   :  { %97 = shalt.err (!%p94_p4)
}
 0x222   :  { %s98_s17 = scalar_lea.hbm %s151_s2, 128 }
 0x223   :  { %p99_p5 = scmp.ne.s32.totalorder %s151_s2, %s98_s17  ;;  %p102_p6 = scmp.lt.u32.totalorder %s98_s17, %s151_s2 }
 0x225   :  { %p104_p7 = pnand %p102_p6, %p99_p5 }
 0x227   :  { %107 = shalt.err (!%p104_p7)
}
 0x228   :  { %68 = dma.vmem_to_hbm [thread:$0]  %s66_s1, 128, %s151_s2, [#allocation3]  }
 0x229   :  { %108 = dma.done.wait [#allocation3], 128  }
 0x22a   :  { %109 = vsyncadd [#allocation3], 4294967168 }
 0x22b   :  { %72 = vsyncpa [#allocation3], 1 }

</bundles_post_ra>
